<compile_context>
chip_gen: v7x
topology: tpu7x:2x2x1
jax: 0.10.0
libtpu: 0.0.40
codegen_flags: <defaults>
</compile_context>

<pallas_src>
import functools
import math

import jax
import jax.numpy as jnp
from jax.experimental import pallas as pl
from jax.experimental.pallas import tpu as pltpu

ALPHA, BETA, GAMMA = 1.0, 0.5, 0.3


# ---------------------------------------------------------------------------
# Generation-aware VMEM planning
# ---------------------------------------------------------------------------
@functools.lru_cache(maxsize=1)
def _vmem_plan():
    """Returns (vmem_limit_bytes, per_streamed_buffer_budget_bytes)."""
    phys = None
    try:
        info = pltpu.get_tpu_info()
        for attr in ("vmem_capacity_bytes", "vmem_bytes", "vmem_size_bytes"):
            val = getattr(info, attr, None)
            if val:
                phys = int(val)
                break
    except Exception:
        phys = None
    if not phys:
        phys = 64 * 1024 * 1024            # conservative fallback (v7x per-TC)
    vmem_limit = (phys * 3) // 4           # ~96 MiB on v5e/v6e, ~48 MiB on v7x
    # Streamed targets buffer is double-buffered; keep comfortable headroom.
    per_buf = 16 * 1024 * 1024 if phys >= 128 * 1024 * 1024 else 8 * 1024 * 1024
    return vmem_limit, per_buf


def _sublane_multiple(itemsize):
    # dtype-native sublane multiple: 8 for f32, 16 for bf16, 32 for int8/fp8
    return max(8, 32 // max(1, int(itemsize)))


# ---------------------------------------------------------------------------
# Kernel: T-tiled reduction + fused recon / BCE / regression statistics
# ---------------------------------------------------------------------------
def _make_kernel(nt, D, pack_k, tt, last_rows, inv_T, use_scratch_acc):
    needs_mask = last_rows != tt

    def kernel(targets_ref, recon_ref, aux_ref, mse_ref, scal_ref, *scratch):
        # Unpacked path: accumulate the T-sum straight into the resident mse
        # output block (constant t index map => flushed once per b-slice), so no
        # extra (B, D) scratch is needed.  Packed path keeps a (Bt, k*D) scratch.
        acc_ref = scratch[0] if use_scratch_acc else mse_ref
        t = pl.program_id(1)

        @pl.when(t == 0)
        def _init():
            acc_ref[...] = jnp.zeros_like(acc_ref)

        @pl.when(t < nt - 1)
        def _accumulate():
            # Full tiles: native-dtype DMA, cast after the copy, no mask work.
            acc_ref[...] += jnp.sum(targets_ref[...].astype(jnp.float32), axis=1)

        @pl.when(t == nt - 1)
        def _finalize():
            blk = targets_ref[...].astype(jnp.float32)
            if needs_mask:
                # Only the final (possibly OOB-padded) tile pays the mask cost.
                row = jax.lax.broadcasted_iota(jnp.int32, blk.shape, 1)
                blk = jnp.where(row < last_rows, blk, 0.0)
            tsum = acc_ref[...] + jnp.sum(blk, axis=1)            # (Bt, Dp)
            if pack_k > 1:
                # One-time fold of the k lane-packed groups back to D lanes.
                folded = tsum[:, 0:D]
                for j in range(1, pack_k):
                    folded = folded + tsum[:, j * D:(j + 1) * D]
                tsum = folded                                      # (Bt, D)
            tgt_mean = tsum * inv_T
            diff = recon_ref[...].astype(jnp.float32) - tgt_mean
            mse = diff * diff
            mse_ref[...] = mse                                     # for quantile glue
            mae_sum = jnp.sum(jnp.abs(diff))
            mse_sum = jnp.sum(mse)

            # Classification BCE + regression MSE (tiny; recomputed per b-slice,
            # the glue reads slice 0).  F.binary_cross_entropy clamps logs at -100.
            aux = aux_ref[...].astype(jnp.float32)                 # (3, B)
            p = aux[0:1, :]
            y = aux[1:2, :]
            r = aux[2:3, :]
            log_p = jnp.maximum(jnp.log(p), -100.0)
            log_1mp = jnp.maximum(jnp.log(1.0 - p), -100.0)
            cls_loss = jnp.mean(-(y * log_p + (1.0 - y) * log_1mp))
            reg_loss = jnp.mean((r - y) * (r - y))

            # Lane-aligned (1, 8, 128) scalar slab:
            #   lane 0 = mae partial sum, 1 = mse partial sum, 2 = cls, 3 = reg
            lane = jax.lax.broadcasted_iota(jnp.int32, (1, 8, 128), 2)
            scal_ref[...] = jnp.where(
                lane == 0, mae_sum,
                jnp.where(lane == 1, mse_sum,
                          jnp.where(lane == 2, cls_loss, reg_loss)))

    return kernel


# ---------------------------------------------------------------------------
# Wrapper
# ---------------------------------------------------------------------------
@functools.partial(jax.jit, static_argnames=("t_block", "b_slices"))
def hybrid_anomaly_loss(recon_pred, cls_pred, reg_pred, targets, labels,
                        t_block=None, b_slices=None):
    B, T, D = targets.shape
    itemsize = jnp.dtype(targets.dtype).itemsize
    mult = _sublane_multiple(itemsize)
    vmem_limit, per_buf = _vmem_plan()

    # ---- optional 2-way "parallel" split over B (both v7x TensorCores) ------
    if b_slices is None:
        b_slices = 2 if (B % 16 == 0) else 1
    nb = b_slices if (b_slices > 1 and B % (8 * b_slices) == 0) else 1
    Bt = B // nb

    # ---- lane packing: make the streamed last dim a multiple of 128 lanes ---
    pack_k = 1
    if D % 128 != 0:
        k = 128 // math.gcd(D, 128)
        if k > 1 and T % k == 0:
            pack_k = k
    Ttiles = T // pack_k
    Dp = D * pack_k
    targets_r = targets.reshape(B, Ttiles, Dp)     # contiguous, no copy

    # ---- T-tile sizing (VMEM-budget driven, lane-padding aware) -------------
    Dp_pad = ((Dp + 127) // 128) * 128
    per_row = max(1, Bt * Dp_pad * itemsize)
    if t_block is not None:
        tt = max(mult, (int(t_block) // mult) * mult)
    else:
        tt = max(mult, ((per_buf // per_row) // mult) * mult)
    tt = min(tt, Ttiles)                           # full-extent block also legal
    nt = -(-Ttiles // tt)
    last_rows = Ttiles - (nt - 1) * tt

    # Pack the three tiny per-sample vectors into one (3, B) input -> one DMA.
    aux = jnp.stack([cls_pred.astype(jnp.float32),
                     labels.astype(jnp.float32),
                     reg_pred.astype(jnp.float32)], axis=0)

    use_scratch_acc = pack_k > 1
    kernel = _make_kernel(nt, D, pack_k, tt, last_rows, 1.0 / float(T),
                          use_scratch_acc)
    scratch_shapes = ([pltpu.VMEM((Bt, Dp), jnp.float32)]
                      if use_scratch_acc else [])

    mse_map, scal = pl.pallas_call(
        kernel,
        out_shape=(jax.ShapeDtypeStruct((B, D), jnp.float32),
                   jax.ShapeDtypeStruct((nb, 8, 128), jnp.float32)),
        grid_spec=pltpu.PrefetchScalarGridSpec(
            num_scalar_prefetch=0,
            grid=(nb, nt),
            in_specs=[
                pl.BlockSpec((Bt, tt, Dp), lambda b, t: (b, t, 0)),  # streamed over T
                pl.BlockSpec((Bt, D), lambda b, t: (b, 0)),          # resident
                pl.BlockSpec((3, B), lambda b, t: (0, 0)),           # resident
            ],
            out_specs=(
                pl.BlockSpec((Bt, D), lambda b, t: (b, 0)),          # mse map
                pl.BlockSpec((1, 8, 128), lambda b, t: (b, 0, 0)),   # per-slice scalars
            ),
            scratch_shapes=scratch_shapes,
        ),
        compiler_params=pltpu.CompilerParams(
            dimension_semantics=("parallel", "arbitrary"),           # B ind., T reduce
            vmem_limit_bytes=int(vmem_limit)),
    )(targets_r, recon_pred, aux)

    # ---- merge per-slice partials --------------------------------------------
    N = B * D
    mae_mean = jnp.sum(scal[:, 0, 0]) / float(N)
    mse_sum = jnp.sum(scal[:, 0, 1])
    cls_loss = scal[0, 0, 2]
    reg_loss = scal[0, 0, 3]

    # TODO(synk): torch.quantile (global selection) has no clean in-kernel Pallas
    # equivalent; done in JAX glue via lax.top_k + linear interpolation (same
    # semantics as torch's default), avoiding the full B*D sort.
    mse_flat = mse_map.reshape(-1)
    pos = 0.9 * (N - 1)
    lo = int(math.floor(pos))
    frac = pos - lo
    k = N - lo
    topk = jax.lax.top_k(mse_flat, k)[0]           # descending; topk[k-1] == v[lo]
    v_lo = topk[k - 1]
    if k >= 2 and frac > 0.0:
        threshold = v_lo + frac * (topk[k - 2] - v_lo)
    else:
        threshold = v_lo
    # penalty = where(mse > thr, 2*mse, mse)  =>  mean = (sum(mse) + sum(mse>thr)) / N
    # (elements outside the top-k are all <= v[lo] <= threshold, so strict '>' holds)
    tail_sum = jnp.sum(jnp.where(topk > threshold, topk, 0.0))
    penalty_mean = (mse_sum + tail_sum) / float(N)
    recon_loss = mae_mean + penalty_mean

    total = ALPHA * recon_loss + BETA * cls_loss + GAMMA * reg_loss
    losses = {
        'reconstruction': recon_loss,
        'classification': cls_loss,
        'regression': reg_loss,
    }
    return total, losses


# ---------------------------------------------------------------------------
# Pure-JAX reference (mirrors the PyTorch forward exactly)
# ---------------------------------------------------------------------------
def reference_loss(recon_pred, cls_pred, reg_pred, targets, labels):
    tgt = jnp.mean(targets.astype(jnp.float32), axis=1)
    diff = recon_pred.astype(jnp.float32) - tgt
    mse = diff * diff
    mae = jnp.abs(diff)
    thr = jnp.quantile(mse.reshape(-1), 0.9)
    penalty = jnp.where(mse > thr, mse * 2.0, mse)
    recon_loss = mae.mean() + penalty.mean()
    log_p = jnp.maximum(jnp.log(cls_pred), -100.0)
    log_1mp = jnp.maximum(jnp.log(1.0 - cls_pred), -100.0)
    cls_loss = jnp.mean(-(labels * log_p + (1.0 - labels) * log_1mp))
    reg_loss = jnp.mean((reg_pred - labels) ** 2)
    total = ALPHA * recon_loss + BETA * cls_loss + GAMMA * reg_loss
    return total, recon_loss, cls_loss, reg_loss


def _check(total, losses, ref):
    ref_total, ref_recon, ref_cls, ref_reg = ref
    assert jnp.allclose(total, ref_total, rtol=1e-5, atol=1e-5), (total, ref_total)
    assert jnp.allclose(losses['reconstruction'], ref_recon, rtol=1e-5, atol=1e-5)
    assert jnp.allclose(losses['classification'], ref_cls, rtol=1e-5, atol=1e-5)
    assert jnp.allclose(losses['regression'], ref_reg, rtol=1e-5, atol=1e-5)


if __name__ == "__main__":
    key = jax.random.PRNGKey(0)
    keys = jax.random.split(key, 4)

    def make_inputs(k, B, T, D):
        k1, k2, k3, k4, k5 = jax.random.split(k, 5)
        targets = jax.random.normal(k1, (B, T, D), dtype=jnp.float32)
        recon = jax.random.normal(k2, (B, D), dtype=jnp.float32)
        cls = jax.nn.sigmoid(jax.random.normal(k3, (B,), dtype=jnp.float32))
        reg = jax.random.normal(k4, (B,), dtype=jnp.float32)
        lbl = (jax.random.uniform(k5, (B,)) > 0.5).astype(jnp.float32)
        return targets, recon, cls, reg, lbl

    cases = [
        # (B,  T,  D, t_block, b_slices)
        (2,   8, 32, None, None),   # lane-packed (k=4), single full-T tile
        (2,  40, 32, 8,    None),   # lane-packed, multi-tile + masked partial last tile
        (2,  10, 32, 8,    None),   # unpacked fallback (T % 4 != 0), masked last tile
        (16, 24, 32, None, 2),      # 2-way B split ("parallel" axis / v7x megacore)
    ]
    for i, (B, T, D, tb, bs) in enumerate(cases):
        targets, recon, cls, reg, lbl = make_inputs(keys[i], B, T, D)
        total, losses = hybrid_anomaly_loss(recon, cls, reg, targets, lbl,
                                            t_block=tb, b_slices=bs)
        total = jax.block_until_ready(total)
        _check(total, losses, reference_loss(recon, cls, reg, targets, lbl))

    print("KERNEL_OK")
</pallas_src>

<mosaic_0001>
module attributes {stable_mosaic.version = 11 : i64} {
  func.func @kernel(%arg0: i32, %arg1: i32, %arg2: memref<2x2x128xf32, #tpu.memory_space<vmem>>, %arg3: memref<2x32xf32, #tpu.memory_space<vmem>>, %arg4: memref<3x2xf32, #tpu.memory_space<vmem>>, %arg5: memref<2x32xf32, #tpu.memory_space<vmem>>, %arg6: memref<1x8x128xf32, #tpu.memory_space<vmem>>, %arg7: memref<2x128xf32, #tpu.memory_space<vmem>>) attributes {dimension_semantics = [#tpu.dimension_semantics<parallel>, #tpu.dimension_semantics<arbitrary>], iteration_bounds = array<i64: 1, 1>, scalar_prefetch = 0 : i64, scratch_operands = 1 : i64, tpu.core_type = #tpu.core_type<tc>, window_params = [{transform_indices = @transform_0, window_bounds = array<i64: 2, 2, 128>}, {transform_indices = @transform_1, window_bounds = array<i64: 2, 32>}, {pipeline_mode = #tpu.pipeline_mode<synchronous>, transform_indices = @transform_2, window_bounds = array<i64: 3, 2>}, {transform_indices = @transform_3, window_bounds = array<i64: 2, 32>}, {transform_indices = @transform_4, window_bounds = array<i64: 1, 8, 128>}]} {
    %c0_i32 = arith.constant 0 : i32
    %0 = arith.cmpi eq, %arg1, %c0_i32 : i32
    %1 = arith.extui %0 : i1 to i32
    %c0_i32_0 = arith.constant 0 : i32
    %2 = arith.cmpi ne, %1, %c0_i32_0 : i32
    scf.if %2 {
      %cst = arith.constant 0.000000e+00 : f32
      %9 = vector.broadcast %cst : f32 to vector<2x128xf32>
      %c0 = arith.constant 0 : index
      %c0_5 = arith.constant 0 : index
      %10 = vector.load %arg7[%c0, %c0_5] : memref<2x128xf32, #tpu.memory_space<vmem>>, vector<2x128xf32>
      tpu.vector_store %arg7[%c0, %c0_5], %9 {strides = array<i32>} : memref<2x128xf32, #tpu.memory_space<vmem>>, vector<2x128xf32>,
    } else {
    }
    %c0_i32_1 = arith.constant 0 : i32
    %3 = arith.cmpi slt, %arg1, %c0_i32_1 : i32
    %4 = arith.extui %3 : i1 to i32
    %c0_i32_2 = arith.constant 0 : i32
    %5 = arith.cmpi ne, %4, %c0_i32_2 : i32
    scf.if %5 {
      %c0 = arith.constant 0 : index
      %c0_5 = arith.constant 0 : index
      %9 = vector.load %arg7[%c0, %c0_5] : memref<2x128xf32, #tpu.memory_space<vmem>>, vector<2x128xf32>
      %c0_6 = arith.constant 0 : index
      %c0_7 = arith.constant 0 : index
      %c0_8 = arith.constant 0 : index
      %10 = vector.load %arg2[%c0_6, %c0_7, %c0_8] : memref<2x2x128xf32, #tpu.memory_space<vmem>>, vector<2x2x128xf32>
      %cst = arith.constant dense<0.000000e+00> : vector<2x128xf32>
      %11 = vector.multi_reduction <add>, %10, %cst [1] : vector<2x2x128xf32> to vector<2x128xf32>
      %12 = arith.addf %9, %11 : vector<2x128xf32>
      %c0_9 = arith.constant 0 : index
      %c0_10 = arith.constant 0 : index
      %13 = vector.load %arg7[%c0_9, %c0_10] : memref<2x128xf32, #tpu.memory_space<vmem>>, vector<2x128xf32>
      tpu.vector_store %arg7[%c0_9, %c0_10], %12 {strides = array<i32>} : memref<2x128xf32, #tpu.memory_space<vmem>>, vector<2x128xf32>,
    } else {
    }
    %c0_i32_3 = arith.constant 0 : i32
    %6 = arith.cmpi eq, %arg1, %c0_i32_3 : i32
    %7 = arith.extui %6 : i1 to i32
    %c0_i32_4 = arith.constant 0 : i32
    %8 = arith.cmpi ne, %7, %c0_i32_4 : i32
    scf.if %8 {
      %c0 = arith.constant 0 : index
      %c0_5 = arith.constant 0 : index
      %c0_6 = arith.constant 0 : index
      %9 = vector.load %arg2[%c0, %c0_5, %c0_6] : memref<2x2x128xf32, #tpu.memory_space<vmem>>, vector<2x2x128xf32>
      %c0_7 = arith.constant 0 : index
      %c0_8 = arith.constant 0 : index
      %10 = vector.load %arg7[%c0_7, %c0_8] : memref<2x128xf32, #tpu.memory_space<vmem>>, vector<2x128xf32>
      %cst = arith.constant dense<0.000000e+00> : vector<2x128xf32>
      %11 = vector.multi_reduction <add>, %9, %cst [1] : vector<2x2x128xf32> to vector<2x128xf32>
      %12 = arith.addf %10, %11 : vector<2x128xf32>
      %13 = vector.extract_strided_slice %12 {offsets = [0, 0], sizes = [2, 32], strides = [1, 1]} : vector<2x128xf32> to vector<2x32xf32>
      %14 = vector.extract_strided_slice %12 {offsets = [0, 32], sizes = [2, 32], strides = [1, 1]} : vector<2x128xf32> to vector<2x32xf32>
      %15 = arith.addf %13, %14 : vector<2x32xf32>
      %16 = vector.extract_strided_slice %12 {offsets = [0, 64], sizes = [2, 32], strides = [1, 1]} : vector<2x128xf32> to vector<2x32xf32>
      %17 = arith.addf %15, %16 : vector<2x32xf32>
      %18 = vector.extract_strided_slice %12 {offsets = [0, 96], sizes = [2, 32], strides = [1, 1]} : vector<2x128xf32> to vector<2x32xf32>
      %19 = arith.addf %17, %18 : vector<2x32xf32>
      %cst_9 = arith.constant 1.250000e-01 : f32
      %20 = vector.broadcast %cst_9 : f32 to vector<2x32xf32>
      %21 = arith.mulf %19, %20 : vector<2x32xf32>
      %c0_10 = arith.constant 0 : index
      %c0_11 = arith.constant 0 : index
      %22 = vector.load %arg3[%c0_10, %c0_11] : memref<2x32xf32, #tpu.memory_space<vmem>>, vector<2x32xf32>
      %23 = arith.subf %22, %21 : vector<2x32xf32>
      %24 = arith.mulf %23, %23 : vector<2x32xf32>
      %c0_12 = arith.constant 0 : index
      %c0_13 = arith.constant 0 : index
      %25 = vector.load %arg5[%c0_12, %c0_13] : memref<2x32xf32, #tpu.memory_space<vmem>>, vector<2x32xf32>
      tpu.vector_store %arg5[%c0_12, %c0_13], %24 {strides = array<i32>} : memref<2x32xf32, #tpu.memory_space<vmem>>, vector<2x32xf32>,
      %26 = math.absf %23 : vector<2x32xf32>
      %27 = vector.shape_cast %26 : vector<2x32xf32> to vector<1x2x32xf32>
      %cst_14 = arith.constant dense<0.000000e+00> : vector<1xf32>
      %28 = vector.multi_reduction <add>, %27, %cst_14 [1, 2] : vector<1x2x32xf32> to vector<1xf32>
      %29 = vector.shape_cast %28 : vector<1xf32> to vector<1x1x1xf32>
      %30 = vector.extract %29[0, 0, 0] : f32 from vector<1x1x1xf32>
      %31 = vector.shape_cast %24 : vector<2x32xf32> to vector<1x2x32xf32>
      %cst_15 = arith.constant dense<0.000000e+00> : vector<1xf32>
      %32 = vector.multi_reduction <add>, %31, %cst_15 [1, 2] : vector<1x2x32xf32> to vector<1xf32>
      %33 = vector.shape_cast %32 : vector<1xf32> to vector<1x1x1xf32>
      %34 = vector.extract %33[0, 0, 0] : f32 from vector<1x1x1xf32>
      %c0_16 = arith.constant 0 : index
      %c0_17 = arith.constant 0 : index
      %35 = vector.load %arg4[%c0_16, %c0_17] : memref<3x2xf32, #tpu.memory_space<vmem>>, vector<3x2xf32>
      %36 = vector.extract_strided_slice %35 {offsets = [0, 0], sizes = [1, 2], strides = [1, 1]} : vector<3x2xf32> to vector<1x2xf32>
      %37 = vector.extract_strided_slice %35 {offsets = [1, 0], sizes = [1, 2], strides = [1, 1]} : vector<3x2xf32> to vector<1x2xf32>
      %38 = vector.extract_strided_slice %35 {offsets = [2, 0], sizes = [1, 2], strides = [1, 1]} : vector<3x2xf32> to vector<1x2xf32>
      %39 = math.log %36 : vector<1x2xf32>
      %cst_18 = arith.constant -1.000000e+02 : f32
      %40 = vector.broadcast %cst_18 : f32 to vector<1x2xf32>
      %41 = arith.maximumf %39, %40 : vector<1x2xf32>
      %cst_19 = arith.constant 1.000000e+00 : f32
      %42 = vector.broadcast %cst_19 : f32 to vector<1x2xf32>
      %43 = arith.subf %42, %36 : vector<1x2xf32>
      %44 = math.log %43 : vector<1x2xf32>
      %cst_20 = arith.constant -1.000000e+02 : f32
      %45 = vector.broadcast %cst_20 : f32 to vector<1x2xf32>
      %46 = arith.maximumf %44, %45 : vector<1x2xf32>
      %47 = arith.mulf %37, %41 : vector<1x2xf32>
      %cst_21 = arith.constant 1.000000e+00 : f32
      %48 = vector.broadcast %cst_21 : f32 to vector<1x2xf32>
      %49 = arith.subf %48, %37 : vector<1x2xf32>
      %50 = arith.mulf %49, %46 : vector<1x2xf32>
      %51 = arith.addf %47, %50 : vector<1x2xf32>
      %cst_22 = arith.constant 0.000000e+00 : f32
      %52 = vector.broadcast %cst_22 : f32 to vector<1x2xf32>
      %53 = arith.subf %52, %51 : vector<1x2xf32>
      %54 = vector.shape_cast %53 : vector<1x2xf32> to vector<1x1x2xf32>
      %cst_23 = arith.constant dense<0.000000e+00> : vector<1xf32>
      %55 = vector.multi_reduction <add>, %54, %cst_23 [1, 2] : vector<1x1x2xf32> to vector<1xf32>
      %56 = vector.shape_cast %55 : vector<1xf32> to vector<1x1x1xf32>
      %57 = vector.extract %56[0, 0, 0] : f32 from vector<1x1x1xf32>
      %cst_24 = arith.constant 2.000000e+00 : f32
      %58 = arith.divf %57, %cst_24 : f32
      %59 = arith.subf %38, %37 : vector<1x2xf32>
      %60 = arith.subf %38, %37 : vector<1x2xf32>
      %61 = arith.mulf %59, %60 : vector<1x2xf32>
      %62 = vector.shape_cast %61 : vector<1x2xf32> to vector<1x1x2xf32>
      %cst_25 = arith.constant dense<0.000000e+00> : vector<1xf32>
      %63 = vector.multi_reduction <add>, %62, %cst_25 [1, 2] : vector<1x1x2xf32> to vector<1xf32>
      %64 = vector.shape_cast %63 : vector<1xf32> to vector<1x1x1xf32>
      %65 = vector.extract %64[0, 0, 0] : f32 from vector<1x1x1xf32>
      %cst_26 = arith.constant 2.000000e+00 : f32
      %66 = arith.divf %65, %cst_26 : f32
      %67 = tpu.iota {dimensions = array<i32: 2>} : vector<1x8x128xi32>
      %c0_i32_27 = arith.constant 0 : i32
      %68 = vector.broadcast %c0_i32_27 : i32 to vector<1x8x128xi32>
      %69 = arith.cmpi eq, %67, %68 : vector<1x8x128xi32>
      %c1_i32 = arith.constant 1 : i32
      %70 = vector.broadcast %c1_i32 : i32 to vector<1x8x128xi32>
      %71 = arith.cmpi eq, %67, %70 : vector<1x8x128xi32>
      %c2_i32 = arith.constant 2 : i32
      %72 = vector.broadcast %c2_i32 : i32 to vector<1x8x128xi32>
      %73 = arith.cmpi eq, %67, %72 : vector<1x8x128xi32>
      %74 = vector.broadcast %58 : f32 to vector<1x8x128xf32>
      %75 = vector.broadcast %66 : f32 to vector<1x8x128xf32>
      %76 = arith.select %73, %74, %75 : vector<1x8x128xi1>, vector<1x8x128xf32>
      %77 = vector.broadcast %34 : f32 to vector<1x8x128xf32>
      %78 = arith.select %71, %77, %76 : vector<1x8x128xi1>, vector<1x8x128xf32>
      %79 = vector.broadcast %30 : f32 to vector<1x8x128xf32>
      %80 = arith.select %69, %79, %78 : vector<1x8x128xi1>, vector<1x8x128xf32>
      %c0_28 = arith.constant 0 : index
      %c0_29 = arith.constant 0 : index
      %c0_30 = arith.constant 0 : index
      %81 = vector.load %arg6[%c0_28, %c0_29, %c0_30] : memref<1x8x128xf32, #tpu.memory_space<vmem>>, vector<1x8x128xf32>
      tpu.vector_store %arg6[%c0_28, %c0_29, %c0_30], %80 {strides = array<i32>} : memref<1x8x128xf32, #tpu.memory_space<vmem>>, vector<1x8x128xf32>,
    } else {
    }
    return
  }
  func.func @transform_0(%arg0: i32, %arg1: i32) -> (i32, i32, i32) {
    %c0_i32 = arith.constant 0 : i32
    %c0_i32_0 = arith.constant 0 : i32
    return %arg0, %arg1, %c0_i32 : i32, i32, i32
  }
  func.func @transform_1(%arg0: i32, %arg1: i32) -> (i32, i32) {
    %c0_i32 = arith.constant 0 : i32
    %c0_i32_0 = arith.constant 0 : i32
    return %arg0, %c0_i32 : i32, i32
  }
  func.func @transform_2(%arg0: i32, %arg1: i32) -> (i32, i32) {
    %c0_i32 = arith.constant 0 : i32
    %c0_i32_0 = arith.constant 0 : i32
    %c0_i32_1 = arith.constant 0 : i32
    return %c0_i32, %c0_i32_0 : i32, i32
  }
  func.func @transform_3(%arg0: i32, %arg1: i32) -> (i32, i32) {
    %c0_i32 = arith.constant 0 : i32
    %c0_i32_0 = arith.constant 0 : i32
    return %arg0, %c0_i32 : i32, i32
  }
  func.func @transform_4(%arg0: i32, %arg1: i32) -> (i32, i32, i32) {
    %c0_i32 = arith.constant 0 : i32
    %c0_i32_0 = arith.constant 0 : i32
    %c0_i32_1 = arith.constant 0 : i32
    return %arg0, %c0_i32, %c0_i32_0 : i32, i32, i32
  }
}

</mosaic_0001>

<bundles_post_ra>
// kernel: hybrid_anomaly_loss.1
= control target key start
LH: loop header
LB: loop body
LE: loop exit
PB: predicated region body
PF: predicated region fallthrough
CT: control target
= control target key end

     0   :  { %vm56_vm0 = vcmask 1041408   ;;  %v210_v0 = vmov 0.0   ;;  %vm73_vm1 = vcmask 1041409   ;;  %s211_s19 = smov 96   ;;  %s213_s20 = smov 64   ;;  %vm94_vm2 = vcmask 254976   ;;  %s257_s0 = inlined_call_operand.vmem [shape: f32[2,2,128], index: 0, kind: input, shape index: {}]   ;;  %s258_s2 = inlined_call_operand.vmem [shape: f32[3,2], index: 2, kind: input, shape index: {}]   ;;  %s259_s1 = inlined_call_operand.vmem [shape: f32[2,32], index: 1, kind: input, shape index: {}]   ;;  %s260_s3 = inlined_call_operand.vmem [shape: f32[2,32], index: 3, kind: output, shape index: {0}]   ;;  %s261_s4 = inlined_call_operand.vmem [shape: f32[1,8,128], index: 4, kind: output, shape index: {1}]  }
   0x1   :  { %20 = vst [vmem:[#allocation2] sm:$0x3] %v210_v0  ;;  %v53_v1 = vld [vmem:[%s257_s0] sm:$0x3]  ;;  %v54_v2 = vld [vmem:[%s257_s0 + $0x2] sm:$0x3] }
   0x2   :  { %v57_v3 = vsel %vm56_vm0, %v53_v1, 0.0  ;;  %v64_v4 = vsel %vm56_vm0, %v54_v2, 0.0  ;;  %s212_s0 = smov 32   ;;  %v117_v20 = vld [vmem:[%s258_s2] sm:$0x7]  ;;  %vm138_vm3 = vcmask 8192  }
   0x3   :  { %v58_v5 = vrot.slane %v57_v3, 4  ;;  %v65_v6 = vrot.slane %v64_v4, 4  ;;  %v121_v21 = vsub.f32 1.0, %v117_v20  ;;  %206 = vlog2.f32 %v117_v20  ;;  %v91_v41 = vld [vmem:[%s259_s1] sm:$0x3] }
   0x4   :  { %v153_v31 = vrot.slane %v117_v20, 7 }
   0x5   :  { %v59_v7 = vadd.f32 %v58_v5, %v57_v3  ;;  %v66_v8 = vadd.f32 %v65_v6, %v64_v4  ;;  %208 = vlog2.f32 %v121_v21 }
   0x6   :  { %v155_v38 = vsub.f32 %v117_v20, %v153_v31 }
   0x7   :  { %v60_v9 = vrot.slane %v59_v7, 2  ;;  %v67_v10 = vrot.slane %v66_v8, 2 }
   0x8   :  { %v55_v15 = vld [vmem:[#allocation2] sm:$0x3]  ;;  %v156_v43 = vmul.f32 %v155_v38, %v155_v38 }
   0x9   :  { %v61_v11 = vadd.f32 %v60_v9, %v59_v7  ;;  %v68_v12 = vadd.f32 %v67_v10, %v66_v8 }
   0xa   :  { %v158_v48 = vrot.slane %v156_v43, 2 }
   0xb   :  { %v62_v13 = vrot.slane %v61_v11, 1  ;;  %v69_v14 = vrot.slane %v68_v12, 1 }
   0xc   :  { %v160_v52 = vsel %vm138_vm3, %v158_v48, 0.0 }
   0xd   :  { %v63_v16 = vadd.f32 %v62_v13, %v61_v11  ;;  %v70_v17 = vadd.f32 %v69_v14, %v68_v12  ;;  %v207_v22 = vpop.eup %206 }
   0xe   :  { %v119_v24 = vmul.f32 0.6931472, %v207_v22 }
   0xf   :  { %v74_v18 = vsel %vm73_vm1, %v70_v17, %v63_v16  ;;  %v209_v23 = vpop.eup %208 }
  0x10   :  { %v76_v19 = vadd.f32 %v74_v18, %v55_v15  ;;  %v123_v25 = vmul.f32 0.6931472, %v209_v23  ;;  %v120_v26 = vmax.f32 %v119_v24, -100.0  ;;  %v173_v18 = vlaneseq }
  0x12   :  { %78 = vrot.lane.b32.xlu0 %v76_v19, %s211_s19  ;;  %86 = vrot.lane.b32.xlu1 %v76_v19, %s212_s0  ;;  %v124_v27 = vmax.f32 %v123_v25, -100.0  ;;  %v126_v28 = vrot.slane %v120_v26, 7 }
  0x14   :  { %v130_v29 = vrot.slane %v124_v27, 7  ;;  %v128_v32 = vmul.f32 %v126_v28, %v117_v20 }
  0x16   :  { %82 = vrot.lane.b32.xlu0 %v76_v19, %s213_s20  ;;  %v132_v33 = vmul.f32 %v130_v29, %v121_v21 }
  0x18   :  { %v133_v39 = vadd.f32 %v132_v33, %v128_v32 }
  0x1a   :  { %v134_v44 = vsub.f32 0.0, %v133_v39 }
  0x1c   :  { %v136_v49 = vrot.slane %v134_v44, 1 }
  0x1e   :  { %v139_v53 = vsel %vm138_vm3, %v136_v49, 0.0 }
  0x84   :  { %v79_v30 = vpop.permute.xlu0 %78  ;;  %v87_v36 = vpop.permute.xlu1 %86 }
  0x85   :  { %v81_v34 = vadd.f32 %v79_v30, %v76_v19  ;;  %v174_v19 = vand.u32 127, %v173_v18 }
  0x87   :  { %vm177_vm4 = vcmp.eq.s32.totalorder %v174_v19, 2  ;;  %vm176_vm5 = vcmp.eq.s32.totalorder %v174_v19, 1  ;;  %vm175_vm6 = vcmp.eq.s32.totalorder %v174_v19, 0 }
  0x88   :  { %v83_v35 = vpop.permute.xlu0 %82 }
  0x89   :  { %v85_v37 = vadd.f32 %v83_v35, %v81_v34 }
  0x8b   :  { %v89_v40 = vadd.f32 %v87_v36, %v85_v37 }
  0x8d   :  { %v90_v42 = vmul.f32 0.125, %v89_v40 }
  0x8f   :  { %v92_v45 = vsub.f32 %v91_v41, %v90_v42 }
  0x91   :  { %v96_v46 = vand.u32 2147483647, %v92_v45  ;;  %v93_v47 = vmul.f32 %v92_v45, %v92_v45 }
  0x93   :  { %v97_v50 = vsel %vm94_vm2, %v96_v46, 0.0  ;;  %v107_v51 = vsel %vm94_vm2, %v93_v47, 0.0  ;;  %95 = vst.msk [vmem:[%s260_s3] sm:$0x3] %vm94_vm2, %v93_v47 }
  0x94   :  { %98 = vadd.xlane.f32.xlu1 %v97_v50  ;;  %108 = vadd.xlane.f32.xlu0 %v107_v51 }
  0x98   :  { %161 = vadd.xlane.f32.xlu1 %v160_v52  ;;  %140 = vadd.xlane.f32.xlu0 %v139_v53 }
 0x121   :  { %v99_v54 = vpop.xlane.xlu1 %98  ;;  %v109_v55 = vpop.xlane.xlu0 %108 }
 0x122   :  { %v100_v56 = vrot.slane %v99_v54, 4  ;;  %v110_v57 = vrot.slane %v109_v55, 4 }
 0x124   :  { %v101_v58 = vadd.f32 %v100_v56, %v99_v54  ;;  %v111_v59 = vadd.f32 %v110_v57, %v109_v55 }
 0x125   :  { %v162_v60 = vpop.xlane.xlu1 %161  ;;  %v141_v61 = vpop.xlane.xlu0 %140 }
 0x126   :  { %v102_v62 = vrot.slane %v101_v58, 2  ;;  %v112_v63 = vrot.slane %v111_v59, 2  ;;  %v163_v0 = vrot.slane %v162_v60, 4  ;;  %v142_v1 = vrot.slane %v141_v61, 4 }
 0x128   :  { %v164_v2 = vadd.f32 %v163_v0, %v162_v60  ;;  %v143_v3 = vadd.f32 %v142_v1, %v141_v61  ;;  %v103_v4 = vadd.f32 %v102_v62, %v101_v58  ;;  %v113_v5 = vadd.f32 %v112_v63, %v111_v59 }
 0x12a   :  { %v165_v6 = vrot.slane %v164_v2, 2  ;;  %v144_v7 = vrot.slane %v143_v3, 2  ;;  %v104_v8 = vrot.slane %v103_v4, 1  ;;  %v114_v9 = vrot.slane %v113_v5, 1 }
 0x12c   :  { %v166_v10 = vadd.f32 %v165_v6, %v164_v2  ;;  %v145_v11 = vadd.f32 %v144_v7, %v143_v3  ;;  %v105_v12 = vadd.f32 %v104_v8, %v103_v4  ;;  %v115_v13 = vadd.f32 %v114_v9, %v113_v5 }
 0x12e   :  { %194 = vpush %v105_v12  ;;  %v146_v14 = vrot.slane %v145_v11, 1  ;;  %v167_v15 = vrot.slane %v166_v10, 1 }
 0x12f   :  { %196 = vpush %v115_v13 }
 0x130   :  { %v147_v16 = vadd.f32 %v146_v14, %v145_v11  ;;  %v168_v17 = vadd.f32 %v167_v15, %v166_v10 }
 0x132   :  { %198 = vpush %v147_v16 }
 0x133   :  { %200 = vpush %v168_v17 }
 0x15f   :  { %s195_s1 = spop %194 }
 0x160   :  { %s197_s3 = spop %196  ;;  %v183_v24 = vstv %s195_s1 }
 0x161   :  { %v181_v22 = vstv %s197_s3 }
 0x163   :  { %s199_s26 = spop %198 }
 0x164   :  { %s151_s27 = smul.f32 0.5, %s199_s26  ;;  %s201_s28 = spop %200 }
 0x165   :  { %s172_s29 = smul.f32 0.5, %s201_s28 }
 0x166   :  { %v178_v20 = vstv %s151_s27 }
 0x167   :  { %v179_v21 = vstv %s172_s29 }
 0x168   :  { %v180_v23 = vsel %vm177_vm4, %v178_v20, %v179_v21 }
 0x169   :  { %v182_v25 = vsel %vm176_vm5, %v181_v22, %v180_v23 }
 0x16a   :  { %v184_v26 = vsel %vm175_vm6, %v183_v24, %v182_v25 }
 0x16b   :  { %185 = vst [vmem:[%s261_s4] sm:$0xff] %v184_v26 }

</bundles_post_ra>
